<compile_context>
chip_gen: v7x
topology: tpu7x:2x2x1
jax: 0.10.0
libtpu: 0.0.40
codegen_flags: <defaults>
</compile_context>

<pallas_src>
import functools

import jax
import jax.numpy as jnp
from jax.experimental import pallas as pl
from jax.experimental.pallas import tpu as pltpu

_LANE = 128      # lane width (last-dim alignment for the output / weight slab)
_SUBLANE = 8     # f32 sublane count (second-to-last dim alignment)


def _round_up(x, m):
    return (x + m - 1) // m * m


def _linear_kernel(x_ref, w_ref, b_ref, o_ref):
    # MXU matmul [TILE_N, D] x [D, C_pad], f32 accumulate, bias broadcast-add,
    # lane-dense store.
    acc = jnp.dot(x_ref[...], w_ref[...], preferred_element_type=jnp.float32)
    o_ref[...] = (acc + b_ref[...]).astype(o_ref.dtype)


@functools.partial(jax.jit, static_argnames=("tile_n",))
def logistic_regression1_forward(x, weight, bias, *, tile_n=512):
    """x: [N, D] f32, weight: [C, D] (PyTorch nn.Linear convention), bias: [C]."""
    n, d = x.shape
    c = weight.shape[0]
    itemsize = jnp.dtype(x.dtype).itemsize

    # Lane-aligned class dim so the output (and the resident weight slab) are
    # lane-dense; D is left untouched so x needs no wrapper-side copy.
    c_pad = _round_up(c, _LANE)

    # Row tile: as large as possible while the double-buffered working set
    #   2*tn*d + 2*tn*c_pad  (x / out, double-buffered)
    #   + d*c_pad + c_pad    (resident weight + bias)
    # stays comfortably under the scoped-VMEM budget.
    budget = 24 * 1024 * 1024
    per_row = 2 * (d + c_pad) * itemsize
    fixed = (d * c_pad + c_pad) * itemsize
    max_rows = max(_SUBLANE, (budget - fixed) // max(per_row, 1))
    tn = min(tile_n, _round_up(n, _SUBLANE), (max_rows // _SUBLANE) * _SUBLANE)
    tn = max(tn, _SUBLANE)

    n_pad = _round_up(n, tn)

    # Stream x as-is; pad rows only when the tile does not divide N (padded rows
    # are sliced off below).  Weight/bias pads are tiny and paid once.
    x_in = x if n_pad == n else jnp.pad(x, ((0, n_pad - n), (0, 0)))
    w_p = jnp.zeros((d, c_pad), weight.dtype).at[:, :c].set(weight.T)
    b_p = jnp.zeros((1, c_pad), bias.dtype).at[0, :c].set(bias)

    grid = (n_pad // tn,)

    out_padded = pl.pallas_call(
        _linear_kernel,
        out_shape=jax.ShapeDtypeStruct((n_pad, c_pad), x.dtype),
        grid_spec=pl.GridSpec(
            grid=grid,
            in_specs=[
                pl.BlockSpec((tn, d), lambda i: (i, 0)),        # x tile streams
                pl.BlockSpec((d, c_pad), lambda i: (0, 0)),     # W resident
                pl.BlockSpec((1, c_pad), lambda i: (0, 0)),     # b resident
            ],
            out_specs=pl.BlockSpec((tn, c_pad), lambda i: (i, 0)),
        ),
        compiler_params=pltpu.CompilerParams(
            # No cross-block dependence -> parallel: shards across v7x's 2 TCs.
            dimension_semantics=("parallel",),
            vmem_limit_bytes=32 * 1024 * 1024,
        ),
        cost_estimate=pl.CostEstimate(
            flops=2 * n * d * c,
            transcendentals=0,
            bytes_accessed=itemsize * (n * d + d * c + n * c),
        ),
    )(x_in, w_p, b_p)

    return out_padded[:n, :c]


if __name__ == "__main__":
    # Small shapes consistent with the module: num_dim=32 features, num_class=8,
    # batch of N=16 "nodes".
    N, NUM_DIM, NUM_CLASS = 16, 32, 8

    key = jax.random.PRNGKey(0)
    kx, kw, kb = jax.random.split(key, 3)

    x = jax.random.normal(kx, (N, NUM_DIM), dtype=jnp.float32)

    # nn.Linear(num_dim, num_class)-shaped params: weight [C, D], bias [C],
    # uniform in +/- 1/sqrt(num_dim) like PyTorch's default init.
    bound = 1.0 / (NUM_DIM ** 0.5)
    weight = jax.random.uniform(
        kw, (NUM_CLASS, NUM_DIM), minval=-bound, maxval=bound, dtype=jnp.float32
    )
    bias = jax.random.uniform(
        kb, (NUM_CLASS,), minval=-bound, maxval=bound, dtype=jnp.float32
    )

    g = None  # graph argument is unused by the forward pass

    logits = logistic_regression1_forward(x, weight, bias)
    jax.block_until_ready(logits)

    # Reference check against plain JAX (x @ W^T + b).
    ref = x @ weight.T + bias
    assert logits.shape == (N, NUM_CLASS)
    assert jnp.allclose(logits, ref, atol=1e-5, rtol=1e-5)

    print("KERNEL_OK")
</pallas_src>

<mosaic_0001>
module attributes {stable_mosaic.version = 11 : i64} {
  func.func @_linear_kernel(%arg0: i32, %arg1: memref<16x32xf32, #tpu.memory_space<vmem>>, %arg2: memref<32x128xf32, #tpu.memory_space<vmem>>, %arg3: memref<1x128xf32, #tpu.memory_space<vmem>>, %arg4: memref<16x128xf32, #tpu.memory_space<vmem>>) attributes {dimension_semantics = [#tpu.dimension_semantics<parallel>], iteration_bounds = array<i64: 1>, scalar_prefetch = 0 : i64, scratch_operands = 0 : i64, tpu.core_type = #tpu.core_type<tc>, window_params = [{transform_indices = @transform_0, window_bounds = array<i64: 16, 32>}, {pipeline_mode = #tpu.pipeline_mode<synchronous>, transform_indices = @transform_1, window_bounds = array<i64: 32, 128>}, {pipeline_mode = #tpu.pipeline_mode<synchronous>, transform_indices = @transform_2, window_bounds = array<i64: 1, 128>}, {transform_indices = @transform_3, window_bounds = array<i64: 16, 128>}]} {
    %c0 = arith.constant 0 : index
    %c0_0 = arith.constant 0 : index
    %0 = vector.load %arg1[%c0, %c0_0] : memref<16x32xf32, #tpu.memory_space<vmem>>, vector<16x32xf32>
    %c0_1 = arith.constant 0 : index
    %c0_2 = arith.constant 0 : index
    %1 = vector.load %arg2[%c0_1, %c0_2] : memref<32x128xf32, #tpu.memory_space<vmem>>, vector<32x128xf32>
    %cst = arith.constant dense<0.000000e+00> : vector<16x128xf32>
    %2 = tpu.matmul %0, %1, %cst {dimension_numbers = #tpu.dot_dimension_numbers<[1], [0], [0], [1], [0, 0, 1, 1], [], []>} : vector<16x32xf32>, vector<32x128xf32>, vector<16x128xf32> -> vector<16x128xf32>
    %c0_3 = arith.constant 0 : index
    %c0_4 = arith.constant 0 : index
    %3 = vector.load %arg3[%c0_3, %c0_4] : memref<1x128xf32, #tpu.memory_space<vmem>>, vector<1x128xf32>
    %4 = vector.broadcast %3 : vector<1x128xf32> to vector<16x128xf32>
    %5 = arith.addf %2, %4 : vector<16x128xf32>
    %c0_5 = arith.constant 0 : index
    %c0_6 = arith.constant 0 : index
    %6 = vector.load %arg4[%c0_5, %c0_6] : memref<16x128xf32, #tpu.memory_space<vmem>>, vector<16x128xf32>
    tpu.vector_store %arg4[%c0_5, %c0_6], %5 {strides = array<i32>} : memref<16x128xf32, #tpu.memory_space<vmem>>, vector<16x128xf32>,
    return
  }
  func.func @transform_0(%arg0: i32) -> (i32, i32) {
    %c0_i32 = arith.constant 0 : i32
    %c0_i32_0 = arith.constant 0 : i32
    return %arg0, %c0_i32 : i32, i32
  }
  func.func @transform_1(%arg0: i32) -> (i32, i32) {
    %c0_i32 = arith.constant 0 : i32
    %c0_i32_0 = arith.constant 0 : i32
    %c0_i32_1 = arith.constant 0 : i32
    return %c0_i32, %c0_i32_0 : i32, i32
  }
  func.func @transform_2(%arg0: i32) -> (i32, i32) {
    %c0_i32 = arith.constant 0 : i32
    %c0_i32_0 = arith.constant 0 : i32
    %c0_i32_1 = arith.constant 0 : i32
    return %c0_i32, %c0_i32_0 : i32, i32
  }
  func.func @transform_3(%arg0: i32) -> (i32, i32) {
    %c0_i32 = arith.constant 0 : i32
    %c0_i32_0 = arith.constant 0 : i32
    return %arg0, %c0_i32 : i32, i32
  }
}

</mosaic_0001>

<bundles_post_ra>
// kernel: logistic_regression1_forward.1
= control target key start
LH: loop header
LB: loop body
LE: loop exit
PB: predicated region body
PF: predicated region fallthrough
CT: control target
= control target key end

     0   :  { %vm27_vm0 = vcmask 261120   ;;  %s190_s1 = inlined_call_operand.vmem [shape: f32[32,128], index: 1, kind: input, shape index: {}]   ;;  %s191_s0 = inlined_call_operand.vmem [shape: f32[16,32], index: 0, kind: input, shape index: {}]   ;;  %s192_s2 = inlined_call_operand.vmem [shape: f32[1,128], index: 2, kind: input, shape index: {}]   ;;  %s193_s3 = inlined_call_operand.vmem [shape: f32[16,128], index: 3, kind: output, shape index: {}]  }
   0x1   :  { %v16_v0 = vld [vmem:[%s190_s1] sm:$0xff]  ;;  %v17_v1 = vld [vmem:[%s190_s1 + $0x8] sm:$0xff]  ;;  %v18_v2 = vld [vmem:[%s190_s1 + $0x10] sm:$0xff] }
   0x2   :  { %v135_v3 = vpack.c.bf16 %v17_v1, %v16_v0  ;;  %v19_v4 = vld [vmem:[%s190_s1 + $0x18] sm:$0xff]  ;;  %v14_v5 = vld [vmem:[%s191_s0] sm:$0xff]  ;;  %v15_v7 = vld [vmem:[%s191_s0 + $0x8] sm:$0xff] }
   0x3   :  { %v139_v6 = vpack.c.bf16 %v19_v4, %v18_v2  ;;  %132 = vmatprep.mubr.msk.f32.mxu0 %vm27_vm0, %v14_v5  ;;  %v115_v8 = vld [vmem:[%s192_s2] ss:$0 sm:$0xff] }
   0x4   :  { %136 = vmatprep.subr.bf16.mxu0 %v135_v3 }
   0x5   :  { %138 = vmatpush3.bf16.msra.mxu0 %v135_v3 }
   0x6   :  { %140 = vmatprep.subr.bf16.mxu0 %v139_v6 }
   0x9   :  { %142 = vmatpush3.bf16.msra.mxu0 %v139_v6 }
   0xc   :  { %133 = vmatmul.mubr.msk.f32.vlgmr.msra.gmra.mrb[0].mxu0 %vm27_vm0, %v15_v7 }
  0xdf   :  { %v134_v9 = vpop.f32.mrb[0].mxu0 }
  0xe0   :  { %v106_v10 = vadd.f32 %v134_v9, %v115_v8  ;;  %v100_v11 = vpop.f32.mrb[1].mxu0 }
  0xe1   :  { %v101_v12 = vadd.f32 %v115_v8, %v100_v11 }
  0xe2   :  { %110 = vst [vmem:[%s193_s3 + $0x8] sm:$0xff] %v106_v10 }
  0xe3   :  { %109 = vst [vmem:[%s193_s3] sm:$0xff] %v101_v12 }

</bundles_post_ra>
